<compile_context>
chip_gen: v7x
topology: tpu7x:2x2x1
jax: 0.10.0
libtpu: 0.0.40
codegen_flags: <defaults>
</compile_context>

<pallas_src>
import functools
import math

import jax
import jax.numpy as jnp
from jax.experimental import pallas as pl
from jax.experimental.pallas import tpu as pltpu

_LANES = 1024          # slab width: lane-dense, multiple of 128
_MAX_BLOCK_ROWS = 512  # 512 * 1024 * 4B = 2 MiB per f32 input block


# --------------------------------------------------------------------------
# Kernels
# --------------------------------------------------------------------------
def _sq_diff(p_ref, t_ref, w_ref):
    """(pred - target)^2 [* weight], computed in f32 on the VPU."""
    d = p_ref[...].astype(jnp.float32) - t_ref[...].astype(jnp.float32)
    sq = d * d
    if w_ref is not None:
        sq = sq * w_ref[...].astype(jnp.float32)
    return sq


def _store_partial(sq, o_ref):
    """Reduce a (block_rows, LANES) tile to an (8, LANES) partial.

    block_rows is always a multiple of 8 (guaranteed by the wrapper), so this
    is a pure VPU vreg-wise add chain; no per-block cross-lane XLU reduce.
    """
    r, lanes = sq.shape
    o_ref[...] = jnp.sum(sq.reshape(r // 8, 8, lanes), axis=0)


def _mse_sum_kernel(p_ref, t_ref, o_ref):
    _store_partial(_sq_diff(p_ref, t_ref, None), o_ref)


def _mse_sum_kernel_w(p_ref, t_ref, w_ref, o_ref):
    _store_partial(_sq_diff(p_ref, t_ref, w_ref), o_ref)


def _mse_none_kernel(p_ref, t_ref, o_ref, *, scale):
    sq = _sq_diff(p_ref, t_ref, None)
    if scale != 1.0:
        sq = sq * jnp.float32(scale)
    o_ref[...] = sq.astype(o_ref.dtype)


def _mse_none_kernel_w(p_ref, t_ref, w_ref, o_ref, *, scale):
    sq = _sq_diff(p_ref, t_ref, w_ref)
    if scale != 1.0:
        sq = sq * jnp.float32(scale)
    o_ref[...] = sq.astype(o_ref.dtype)


# --------------------------------------------------------------------------
# Wrapper
# --------------------------------------------------------------------------
def _slab_geometry(n):
    """Rows of the (rows, _LANES) slab and the block row count.

    Guarantees: rows % block_rows == 0 and block_rows % 8 == 0 (or block ==
    full array dims), so BlockSpecs are always legal and the reduce kernel can
    use the VPU-only partial-sum path.
    """
    rows0 = -(-n // _LANES)
    if rows0 <= _MAX_BLOCK_ROWS:
        rows = -(-rows0 // 8) * 8              # round up to a multiple of 8
        block_rows = rows                      # single block (grid == 1)
    else:
        rows = -(-rows0 // _MAX_BLOCK_ROWS) * _MAX_BLOCK_ROWS
        block_rows = _MAX_BLOCK_ROWS
    return rows, block_rows


def _to_slab(x, rows):
    """Flatten to a (rows, _LANES) slab in the array's native dtype.

    Only pads (an HBM copy) when the flattened size is not already aligned.
    """
    flat = jnp.ravel(x)
    padded_n = rows * _LANES
    if padded_n != flat.shape[0]:
        flat = jnp.pad(flat, (0, padded_n - flat.shape[0]))
    return flat.reshape(rows, _LANES)


@functools.partial(jax.jit, static_argnames=("reduction", "loss_weight"))
def mse_loss_pallas(pred, target, weight=None, reduction="mean", loss_weight=1.0):
    """MSE (L2) loss matching mmcv's weighted_loss-decorated mse_loss."""
    assert pred.shape == target.shape
    if weight is not None:
        assert weight.shape == pred.shape
    orig_shape = pred.shape
    n = math.prod(orig_shape)

    rows, block_rows = _slab_geometry(n)
    num_blocks = rows // block_rows

    inputs = [_to_slab(pred, rows), _to_slab(target, rows)]
    if weight is not None:
        inputs.append(_to_slab(weight, rows))

    in_spec = pl.BlockSpec((block_rows, _LANES), lambda i: (i, 0))
    params = pltpu.CompilerParams(dimension_semantics=("parallel",))

    if reduction == "none":
        kern = _mse_none_kernel_w if weight is not None else _mse_none_kernel
        out_slab = pl.pallas_call(
            functools.partial(kern, scale=float(loss_weight)),
            out_shape=jax.ShapeDtypeStruct((rows, _LANES), pred.dtype),
            grid_spec=pltpu.PrefetchScalarGridSpec(
                num_scalar_prefetch=0,
                grid=(num_blocks,),
                in_specs=[in_spec] * len(inputs),
                out_specs=in_spec,
            ),
            compiler_params=params,
        )(*inputs)
        return jnp.ravel(out_slab)[:n].reshape(orig_shape)

    if reduction not in ("mean", "sum"):
        raise ValueError(f"unsupported reduction: {reduction}")

    kern = _mse_sum_kernel_w if weight is not None else _mse_sum_kernel
    partials = pl.pallas_call(
        kern,
        out_shape=jax.ShapeDtypeStruct((num_blocks * 8, _LANES), jnp.float32),
        grid_spec=pltpu.PrefetchScalarGridSpec(
            num_scalar_prefetch=0,
            grid=(num_blocks,),
            in_specs=[in_spec] * len(inputs),
            out_specs=pl.BlockSpec((8, _LANES), lambda i: (i, 0)),
        ),
        compiler_params=params,
    )(*inputs)

    total = jnp.sum(partials)               # tiny final cross-lane reduce in JAX
    if reduction == "mean":
        # weighted_loss with 'mean' and no avg_factor: mean over all elements.
        total = total / jnp.float32(n)
    return (loss_weight * total).astype(pred.dtype)


class MSELoss:
    """MSE (L2) loss (Pallas-backed). Mirrors the PyTorch module."""

    def __init__(self, loss_weight=1.0, reduction="mean"):
        self.loss_weight = loss_weight
        self.reduction = reduction

    def __call__(self, pred, target, weight=None, **kwargs):
        return mse_loss_pallas(pred, target, weight=weight,
                               reduction=self.reduction,
                               loss_weight=self.loss_weight)


if __name__ == "__main__":
    key = jax.random.PRNGKey(0)
    k1, k2, k3 = jax.random.split(key, 3)
    # (N, C, H, W) = (2, 4, 16, 16)
    pred = jax.random.normal(k1, (2, 4, 16, 16), dtype=jnp.float32)
    target = jax.random.normal(k2, (2, 4, 16, 16), dtype=jnp.float32)
    weight = jax.random.uniform(k3, (2, 4, 16, 16), dtype=jnp.float32)

    loss_fn = MSELoss(loss_weight=1.0, reduction="mean")

    # unweighted mean (fast 2-input kernel, no ones-weight stream)
    out = jax.block_until_ready(loss_fn(pred, target))
    ref = jnp.mean((pred - target) ** 2)
    assert jnp.allclose(out, ref, rtol=1e-5, atol=1e-5), (out, ref)

    # weighted mean
    out_w = jax.block_until_ready(loss_fn(pred, target, weight=weight))
    ref_w = jnp.mean((pred - target) ** 2 * weight)
    assert jnp.allclose(out_w, ref_w, rtol=1e-5, atol=1e-5), (out_w, ref_w)

    # sum reduction with loss_weight
    loss_sum = MSELoss(loss_weight=0.5, reduction="sum")
    out_s = jax.block_until_ready(loss_sum(pred, target))
    ref_s = 0.5 * jnp.sum((pred - target) ** 2)
    assert jnp.allclose(out_s, ref_s, rtol=1e-5, atol=1e-5), (out_s, ref_s)

    # reduction='none' (loss_weight folded into the kernel)
    loss_none = MSELoss(loss_weight=2.0, reduction="none")
    out_n = jax.block_until_ready(loss_none(pred, target, weight=weight))
    ref_n = 2.0 * (pred - target) ** 2 * weight
    assert out_n.shape == pred.shape
    assert jnp.allclose(out_n, ref_n, rtol=1e-5, atol=1e-5)

    # ragged (non-aligned) shape exercises the wrapper-pad fallback
    pr = jax.random.normal(k1, (2, 3, 15, 17), dtype=jnp.float32)
    tr = jax.random.normal(k2, (2, 3, 15, 17), dtype=jnp.float32)
    out_r = jax.block_until_ready(MSELoss()(pr, tr))
    ref_r = jnp.mean((pr - tr) ** 2)
    assert jnp.allclose(out_r, ref_r, rtol=1e-5, atol=1e-5), (out_r, ref_r)

    # larger shape exercises the multi-block (grid > 1) parallel-partials path
    pb = jax.random.normal(k1, (2, 16, 144, 128), dtype=jnp.float32)
    tb = jax.random.normal(k2, (2, 16, 144, 128), dtype=jnp.float32)
    out_b = jax.block_until_ready(MSELoss(reduction="mean")(pb, tb))
    ref_b = jnp.mean((pb - tb) ** 2)
    assert jnp.allclose(out_b, ref_b, rtol=1e-4, atol=1e-4), (out_b, ref_b)

    print("KERNEL_OK")
</pallas_src>

<mosaic_0001>
module attributes {stable_mosaic.version = 11 : i64} {
  func.func @_mse_sum_kernel(%arg0: i32, %arg1: memref<8x1024xf32, #tpu.memory_space<vmem>>, %arg2: memref<8x1024xf32, #tpu.memory_space<vmem>>, %arg3: memref<8x1024xf32, #tpu.memory_space<vmem>>) attributes {dimension_semantics = [#tpu.dimension_semantics<parallel>], iteration_bounds = array<i64: 1>, scalar_prefetch = 0 : i64, scratch_operands = 0 : i64, tpu.core_type = #tpu.core_type<tc>, window_params = [{transform_indices = @transform_0, window_bounds = array<i64: 8, 1024>}, {transform_indices = @transform_1, window_bounds = array<i64: 8, 1024>}, {transform_indices = @transform_2, window_bounds = array<i64: 8, 1024>}]} {
    %c0 = arith.constant 0 : index
    %c0_0 = arith.constant 0 : index
    %0 = vector.load %arg1[%c0, %c0_0] : memref<8x1024xf32, #tpu.memory_space<vmem>>, vector<8x1024xf32>
    %c0_1 = arith.constant 0 : index
    %c0_2 = arith.constant 0 : index
    %1 = vector.load %arg2[%c0_1, %c0_2] : memref<8x1024xf32, #tpu.memory_space<vmem>>, vector<8x1024xf32>
    %2 = arith.subf %0, %1 : vector<8x1024xf32>
    %3 = arith.mulf %2, %2 : vector<8x1024xf32>
    %4 = vector.shape_cast %3 : vector<8x1024xf32> to vector<1x8x1024xf32>
    %cst = arith.constant dense<0.000000e+00> : vector<8x1024xf32>
    %5 = vector.multi_reduction <add>, %4, %cst [0] : vector<1x8x1024xf32> to vector<8x1024xf32>
    %c0_3 = arith.constant 0 : index
    %c0_4 = arith.constant 0 : index
    %6 = vector.load %arg3[%c0_3, %c0_4] : memref<8x1024xf32, #tpu.memory_space<vmem>>, vector<8x1024xf32>
    tpu.vector_store %arg3[%c0_3, %c0_4], %5 {strides = array<i32>} : memref<8x1024xf32, #tpu.memory_space<vmem>>, vector<8x1024xf32>,
    return
  }
  func.func @transform_0(%arg0: i32) -> (i32, i32) {
    %c0_i32 = arith.constant 0 : i32
    %c0_i32_0 = arith.constant 0 : i32
    return %arg0, %c0_i32 : i32, i32
  }
  func.func @transform_1(%arg0: i32) -> (i32, i32) {
    %c0_i32 = arith.constant 0 : i32
    %c0_i32_0 = arith.constant 0 : i32
    return %arg0, %c0_i32 : i32, i32
  }
  func.func @transform_2(%arg0: i32) -> (i32, i32) {
    %c0_i32 = arith.constant 0 : i32
    %c0_i32_0 = arith.constant 0 : i32
    return %arg0, %c0_i32 : i32, i32
  }
}

</mosaic_0001>

<bundles_post_ra>
// kernel: mse_loss_pallas.1
= control target key start
LH: loop header
LB: loop body
LE: loop exit
PB: predicated region body
PF: predicated region fallthrough
CT: control target
= control target key end

     0   :  { %s150_s0 = inlined_call_operand.vmem [shape: f32[8,1024], index: 0, kind: input, shape index: {}]   ;;  %s151_s1 = inlined_call_operand.vmem [shape: f32[8,1024], index: 1, kind: input, shape index: {}]   ;;  %s152_s2 = inlined_call_operand.vmem [shape: f32[8,1024], index: 2, kind: output, shape index: {}]  }
   0x1   :  { %v11_v0 = vld [vmem:[%s150_s0] sm:$0xff]  ;;  %v12_v2 = vld [vmem:[%s150_s0 + $0x8] sm:$0xff]  ;;  %v13_v5 = vld [vmem:[%s150_s0 + $0x10] sm:$0xff] }
   0x2   :  { %v19_v1 = vld [vmem:[%s151_s1] sm:$0xff]  ;;  %v20_v4 = vld [vmem:[%s151_s1 + $0x8] sm:$0xff]  ;;  %v21_v6 = vld [vmem:[%s151_s1 + $0x10] sm:$0xff] }
   0x3   :  { %v27_v3 = vsub.f32 %v11_v0, %v19_v1  ;;  %v28_v7 = vsub.f32 %v12_v2, %v20_v4  ;;  %v29_v8 = vsub.f32 %v13_v5, %v21_v6  ;;  %v14_v9 = vld [vmem:[%s150_s0 + $0x18] sm:$0xff]  ;;  %v15_v11 = vld [vmem:[%s150_s0 + $0x20] sm:$0xff]  ;;  %v16_v15 = vld [vmem:[%s150_s0 + $0x28] sm:$0xff] }
   0x4   :  { %v22_v10 = vld [vmem:[%s151_s1 + $0x18] sm:$0xff]  ;;  %v23_v14 = vld [vmem:[%s151_s1 + $0x20] sm:$0xff]  ;;  %v24_v16 = vld [vmem:[%s151_s1 + $0x28] sm:$0xff] }
   0x5   :  { %v35_v12 = vmul.f32 %v27_v3, %v27_v3  ;;  %v30_v13 = vsub.f32 %v14_v9, %v22_v10  ;;  %v36_v17 = vmul.f32 %v28_v7, %v28_v7  ;;  %v37_v18 = vmul.f32 %v29_v8, %v29_v8  ;;  %v17_v21 = vld [vmem:[%s150_s0 + $0x30] sm:$0xff]  ;;  %v18_v23 = vld [vmem:[%s150_s0 + $0x38] sm:$0xff] }
   0x6   :  { %v31_v19 = vsub.f32 %v15_v11, %v23_v14  ;;  %v32_v20 = vsub.f32 %v16_v15, %v24_v16  ;;  %v25_v22 = vld [vmem:[%s151_s1 + $0x30] sm:$0xff]  ;;  %v26_v26 = vld [vmem:[%s151_s1 + $0x38] sm:$0xff] }
   0x7   :  { %51 = vst [vmem:[%s152_s2] sm:$0xff] %v35_v12  ;;  %v38_v24 = vmul.f32 %v30_v13, %v30_v13  ;;  %v33_v25 = vsub.f32 %v17_v21, %v25_v22  ;;  %52 = vst [vmem:[%s152_s2 + $0x8] sm:$0xff] %v36_v17  ;;  %v34_v29 = vsub.f32 %v18_v23, %v26_v26 }
   0x8   :  { %53 = vst [vmem:[%s152_s2 + $0x10] sm:$0xff] %v37_v18  ;;  %v39_v27 = vmul.f32 %v31_v19, %v31_v19  ;;  %v40_v28 = vmul.f32 %v32_v20, %v32_v20 }
   0x9   :  { %54 = vst [vmem:[%s152_s2 + $0x18] sm:$0xff] %v38_v24  ;;  %v41_v30 = vmul.f32 %v33_v25, %v33_v25  ;;  %v42_v31 = vmul.f32 %v34_v29, %v34_v29 }
   0xa   :  { %55 = vst [vmem:[%s152_s2 + $0x20] sm:$0xff] %v39_v27  ;;  %56 = vst [vmem:[%s152_s2 + $0x28] sm:$0xff] %v40_v28 }
   0xb   :  { %57 = vst [vmem:[%s152_s2 + $0x30] sm:$0xff] %v41_v30  ;;  %58 = vst [vmem:[%s152_s2 + $0x38] sm:$0xff] %v42_v31 }

</bundles_post_ra>
